<compile_context>
chip_gen: v6e
topology: v6e:2x2x1
jax: 0.10.0
libtpu: 0.0.40
codegen_flags: <defaults>
</compile_context>

<pallas_src>
import jax
import jax.numpy as jnp
import numpy as np
from jax import lax
from jax.experimental import pallas as pl
from jax.experimental.pallas import tpu as pltpu

BN_EPS = 1e-5
_TM_TARGET = 4096                      # lane-rows per grid step (multiple of 128)
_CPARAMS = pltpu.CompilerParams(
    dimension_semantics=("parallel",),       # single M axis -> megacore split on v7x
    vmem_limit_bytes=32 * 1024 * 1024,       # v5e scoped default is only 16 MiB
)


def _round_up(x, m):
    return (x + m - 1) // m * m


def _pick_tiles(m):
    """Tile the M (lane) axis: big tiles to amortize per-step overhead, but
    keep >=4 grid steps when M allows so both v7x TensorCores get work."""
    m128 = _round_up(max(m, 1), 128)
    quarter = _round_up(-(-m128 // 4), 128)
    tm = max(128, min(_TM_TARGET, quarter))
    return tm, _round_up(m128, tm)


# ------------------------------- Pallas kernels -------------------------------

def _stem1_stem2a_kernel(x_ref, w1_ref, b1_ref, w2_ref, b2_ref, o1_ref, o2_ref):
    """Fused stem1 (3x3/s2 conv+BN+ReLU) and stem2a (1x1 conv+BN+ReLU).

    x : (K1, TM)   bf16 im2col patches^T of the network input
    w1: (C1, K1)   bf16 (BN scale folded)    b1: (C1, 1)  f32
    w2: (C2a, C1)  bf16 (BN scale folded)    b2: (C2a, 1) f32
    o1: (C1, TM)   bf16 stem1 activation (branch1, pre-pool)
    o2: (C2a, TM)  bf16 stem2a activation (branch2a)
    """
    y1 = jnp.dot(w1_ref[...], x_ref[...], preferred_element_type=jnp.float32)
    y1 = jnp.maximum(y1 + b1_ref[...], 0.0).astype(jnp.bfloat16)
    o1_ref[...] = y1
    y2 = jnp.dot(w2_ref[...], y1, preferred_element_type=jnp.float32)
    o2_ref[...] = jnp.maximum(y2 + b2_ref[...], 0.0).astype(o2_ref.dtype)


def _stem2b_stem3_kernel(p_ref, pool_ref, w2b_ref, b2b_ref,
                         w3a_ref, w3b_ref, b3_ref, o_ref):
    """Fused stem2b (3x3/s2 conv+BN+ReLU) + concat + stem3 (1x1 conv+BN+ReLU).

    p   : (K2b, TM) bf16 im2col patches^T of branch2a
    pool: (C1, TM)  bf16 max-pooled branch1
    stem3 on cat([pooled_branch1, branch2]) = split-K: w3a@pool + w3b@branch2.
    """
    y2b = jnp.dot(w2b_ref[...], p_ref[...], preferred_element_type=jnp.float32)
    y2b = jnp.maximum(y2b + b2b_ref[...], 0.0).astype(jnp.bfloat16)
    acc = jnp.dot(w3a_ref[...], pool_ref[...], preferred_element_type=jnp.float32)
    acc = acc + jnp.dot(w3b_ref[...], y2b, preferred_element_type=jnp.float32)
    o_ref[...] = jnp.maximum(acc + b3_ref[...], 0.0).astype(o_ref.dtype)


# --------------------------------- glue (JAX) ---------------------------------

def _bn_fold(p):
    scale = p["gamma"] / jnp.sqrt(p["var"] + BN_EPS)
    bias = p["beta"] - p["mean"] * scale
    return scale, bias


def _fold_weight(p, cout_pad, k_pad):
    """Fold BN scale into the conv weight, flatten tap-major/channel-minor to
    (Cout, kh*kw*Cin), zero-pad to (cout_pad, k_pad), cast bf16.
    Bias -> (cout_pad, 1) f32."""
    cout, cin, kh, kw = p["w"].shape
    scale, bias = _bn_fold(p)
    w = jnp.transpose(p["w"], (0, 2, 3, 1)).reshape(cout, kh * kw * cin) * scale[:, None]
    w = jnp.pad(w, ((0, cout_pad - cout), (0, k_pad - kh * kw * cin))).astype(jnp.bfloat16)
    b = jnp.pad(bias, (0, cout_pad - cout)).reshape(cout_pad, 1).astype(jnp.float32)
    return w, b


def _im2col_cf(x_cnhw, kh, kw, stride, pad):
    """(C, N, H, W) -> patches^T (kh*kw*C, N*OH*OW); tap-major / channel-minor,
    matching _fold_weight's flattening."""
    c, n, h, w = x_cnhw.shape
    oh = (h + 2 * pad - kh) // stride + 1
    ow = (w + 2 * pad - kw) // stride + 1
    xp = jnp.pad(x_cnhw, ((0, 0), (0, 0), (pad, pad), (pad, pad)))
    taps = [xp[:, :, i:i + stride * oh:stride, j:j + stride * ow:stride]
            for i in range(kh) for j in range(kw)]
    p = jnp.stack(taps, axis=0)                       # (kh*kw, C, N, OH, OW)
    return p.reshape(kh * kw * c, n * oh * ow), oh, ow


def stem1_stem2a(x_cnhw, p1, p2a):
    """Fused stem1 + stem2a.  x: (Cin, N, H, W) f32.
    Returns branch1 (C1,N,OH,OW) bf16 and branch2a (C2a,N,OH,OW) bf16."""
    cin, n, h, w = x_cnhw.shape
    c1, c2a = p1["w"].shape[0], p2a["w"].shape[0]
    patches, oh, ow = _im2col_cf(x_cnhw, 3, 3, 2, 1)
    k, m = patches.shape
    k_p, c1_p, c2a_p = _round_up(k, 16), _round_up(c1, 16), _round_up(c2a, 16)
    tm, m_p = _pick_tiles(m)

    w1, b1 = _fold_weight(p1, c1_p, k_p)
    w2, b2 = _fold_weight(p2a, c2a_p, c1_p)      # 1x1: K == stem1 out channels
    x_t = jnp.pad(patches.astype(jnp.bfloat16), ((0, k_p - k), (0, m_p - m)))

    br1, br2a = pl.pallas_call(
        _stem1_stem2a_kernel,
        out_shape=(jax.ShapeDtypeStruct((c1_p, m_p), jnp.bfloat16),
                   jax.ShapeDtypeStruct((c2a_p, m_p), jnp.bfloat16)),
        grid=(m_p // tm,),
        in_specs=[pl.BlockSpec((k_p, tm), lambda i: (0, i)),
                  pl.BlockSpec((c1_p, k_p), lambda i: (0, 0)),
                  pl.BlockSpec((c1_p, 1), lambda i: (0, 0)),
                  pl.BlockSpec((c2a_p, c1_p), lambda i: (0, 0)),
                  pl.BlockSpec((c2a_p, 1), lambda i: (0, 0))],
        out_specs=(pl.BlockSpec((c1_p, tm), lambda i: (0, i)),
                   pl.BlockSpec((c2a_p, tm), lambda i: (0, i))),
        compiler_params=_CPARAMS,
    )(x_t, w1, b1, w2, b2)
    return (br1[:c1, :m].reshape(c1, n, oh, ow),
            br2a[:c2a, :m].reshape(c2a, n, oh, ow))


def pool_stem2b_stem3(branch1, branch2a, p2b, p3):
    """ceil-mode MaxPool2d(2,2) in a single XLA pass + fused
    stem2b + concat + stem3 Pallas kernel.  Returns (C3, N, OH2, OW2) f32."""
    c1, n, oh1, ow1 = branch1.shape
    oh2, ow2 = -(-oh1 // 2), -(-ow1 // 2)              # ceil_mode=True
    # -inf padding is safe: every 2x2 window keeps >=1 real (finite) element.
    xp = jnp.pad(branch1, ((0, 0), (0, 0), (0, 2 * oh2 - oh1), (0, 2 * ow2 - ow1)),
                 constant_values=-jnp.inf)
    pooled = xp.reshape(c1, n, oh2, 2, ow2, 2).max(axis=(3, 5))
    pooled = pooled.reshape(c1, n * oh2 * ow2)

    patches, ohb, owb = _im2col_cf(branch2a, 3, 3, 2, 1)
    assert (ohb, owb) == (oh2, ow2)
    k2b, m = patches.shape
    c2b, c3 = p2b["w"].shape[0], p3["w"].shape[0]
    k2b_p = _round_up(k2b, 16)
    c1_p, c2b_p, c3_p = _round_up(c1, 16), _round_up(c2b, 16), _round_up(c3, 16)
    tm, m_p = _pick_tiles(m)

    w2b, b2b = _fold_weight(p2b, c2b_p, k2b_p)
    # concat order matches torch.cat([branch1_pooled, branch2], dim=1)
    s3, bias3 = _bn_fold(p3)
    wmat3 = p3["w"].reshape(c3, c1 + c2b) * s3[:, None]
    w3a = jnp.pad(wmat3[:, :c1], ((0, c3_p - c3), (0, c1_p - c1))).astype(jnp.bfloat16)
    w3b = jnp.pad(wmat3[:, c1:], ((0, c3_p - c3), (0, c2b_p - c2b))).astype(jnp.bfloat16)
    b3 = jnp.pad(bias3, (0, c3_p - c3)).reshape(c3_p, 1).astype(jnp.float32)

    p_arr = jnp.pad(patches.astype(jnp.bfloat16), ((0, k2b_p - k2b), (0, m_p - m)))
    pool_arr = jnp.pad(pooled.astype(jnp.bfloat16), ((0, c1_p - c1), (0, m_p - m)))

    out = pl.pallas_call(
        _stem2b_stem3_kernel,
        out_shape=jax.ShapeDtypeStruct((c3_p, m_p), jnp.float32),
        grid=(m_p // tm,),
        in_specs=[pl.BlockSpec((k2b_p, tm), lambda i: (0, i)),
                  pl.BlockSpec((c1_p, tm), lambda i: (0, i)),
                  pl.BlockSpec((c2b_p, k2b_p), lambda i: (0, 0)),
                  pl.BlockSpec((c2b_p, 1), lambda i: (0, 0)),
                  pl.BlockSpec((c3_p, c1_p), lambda i: (0, 0)),
                  pl.BlockSpec((c3_p, c2b_p), lambda i: (0, 0)),
                  pl.BlockSpec((c3_p, 1), lambda i: (0, 0))],
        out_specs=pl.BlockSpec((c3_p, tm), lambda i: (0, i)),
        compiler_params=_CPARAMS,
    )(p_arr, pool_arr, w2b, b2b, w3a, w3b, b3)
    return out[:c3, :m].reshape(c3, n, oh2, ow2)


def stem_block_forward(x_nchw, params):
    x = jnp.transpose(x_nchw, (1, 0, 2, 3))            # NCHW -> (C, N, H, W)
    branch1, branch2a = stem1_stem2a(x, params["stem1"], params["stem2a"])
    out = pool_stem2b_stem3(branch1, branch2a, params["stem2b"], params["stem3"])
    return jnp.transpose(out, (1, 0, 2, 3))            # (C, N, OH, OW) -> NCHW (f32)


# ----------------------------- deterministic init -----------------------------

def init_params(key, num_input_channels, num_init_features):
    num_stem = num_init_features // 2
    specs = {
        "stem1":  (num_init_features, num_input_channels, 3),
        "stem2a": (num_stem, num_init_features, 1),
        "stem2b": (num_init_features, num_stem, 3),
        "stem3":  (num_init_features, 2 * num_init_features, 1),
    }
    params = {}
    for idx, (name, (cout, cin, k)) in enumerate(specs.items()):
        kkey = jax.random.fold_in(key, idx)
        fan_in = cin * k * k
        w = jax.random.normal(kkey, (cout, cin, k, k), jnp.float32) * (2.0 / fan_in) ** 0.5
        ch = jnp.arange(cout, dtype=jnp.float32)
        params[name] = dict(
            w=w,
            gamma=1.0 + 0.05 * jnp.cos(ch),
            beta=0.02 * jnp.sin(ch),
            mean=0.01 * ch / cout,
            var=1.0 + 0.1 * (ch % 5.0) / 5.0,
        )
    return params


# ------------------------------ pure-JAX reference -----------------------------

def _ref_conv_bn_relu(x_nhwc, p, stride, pad):
    wf = jnp.transpose(p["w"], (2, 3, 1, 0))             # HWIO
    y = lax.conv_general_dilated(x_nhwc, wf, (stride, stride),
                                 [(pad, pad), (pad, pad)],
                                 dimension_numbers=("NHWC", "HWIO", "NHWC"))
    scale, bias = _bn_fold(p)
    return jnp.maximum(y * scale + bias, 0.0)


def _ref_forward(x_nchw, params):
    x = jnp.transpose(x_nchw, (0, 2, 3, 1))
    out = _ref_conv_bn_relu(x, params["stem1"], 2, 1)
    b2 = _ref_conv_bn_relu(out, params["stem2a"], 1, 0)
    b2 = _ref_conv_bn_relu(b2, params["stem2b"], 2, 1)
    h, w = out.shape[1], out.shape[2]
    b1 = lax.reduce_window(out, -jnp.inf, lax.max, (1, 2, 2, 1), (1, 2, 2, 1),
                           ((0, 0), (0, h % 2), (0, w % 2), (0, 0)))  # ceil_mode=True
    cat = jnp.concatenate([b1, b2], axis=-1)
    out = _ref_conv_bn_relu(cat, params["stem3"], 1, 0)
    return jnp.transpose(out, (0, 3, 1, 2))


# ------------------------------------ main -------------------------------------

if __name__ == "__main__":
    key = jax.random.PRNGKey(0)
    num_input_channels, num_init_features = 4, 32
    params = init_params(jax.random.fold_in(key, 200),
                         num_input_channels, num_init_features)
    fwd = jax.jit(stem_block_forward)

    # even spatial dims (no ceil-mode padding)
    x = jax.random.normal(jax.random.fold_in(key, 100),
                          (2, num_input_channels, 16, 16), jnp.float32)
    out = jax.block_until_ready(fwd(x, params))
    assert out.shape == (2, num_init_features, 4, 4), out.shape
    ref = jax.block_until_ready(_ref_forward(x, params))
    # tolerance sized for bf16 matmul inputs (f32 accumulation) vs f32 reference
    np.testing.assert_allclose(np.asarray(out), np.asarray(ref),
                               rtol=2e-2, atol=5e-2)

    # odd spatial dims: exercises ceil-mode pooling and the padded-M path
    x2 = jax.random.normal(jax.random.fold_in(key, 101),
                           (2, num_input_channels, 10, 10), jnp.float32)
    out2 = jax.block_until_ready(fwd(x2, params))
    assert out2.shape == (2, num_init_features, 3, 3), out2.shape
    ref2 = jax.block_until_ready(_ref_forward(x2, params))
    np.testing.assert_allclose(np.asarray(out2), np.asarray(ref2),
                               rtol=2e-2, atol=5e-2)

    print("KERNEL_OK")
</pallas_src>

<mosaic_0001>
module attributes {stable_mosaic.version = 11 : i64} {
  func.func @_stem1_stem2a_kernel(%arg0: i32, %arg1: memref<48x128xbf16, #tpu.memory_space<vmem>>, %arg2: memref<32x48xbf16, #tpu.memory_space<vmem>>, %arg3: memref<32x1xf32, #tpu.memory_space<vmem>>, %arg4: memref<16x32xbf16, #tpu.memory_space<vmem>>, %arg5: memref<16x1xf32, #tpu.memory_space<vmem>>, %arg6: memref<32x128xbf16, #tpu.memory_space<vmem>>, %arg7: memref<16x128xbf16, #tpu.memory_space<vmem>>) attributes {dimension_semantics = [#tpu.dimension_semantics<parallel>], iteration_bounds = array<i64: 1>, scalar_prefetch = 0 : i64, scratch_operands = 0 : i64, tpu.core_type = #tpu.core_type<tc>, window_params = [{transform_indices = @transform_0, window_bounds = array<i64: 48, 128>}, {pipeline_mode = #tpu.pipeline_mode<synchronous>, transform_indices = @transform_1, window_bounds = array<i64: 32, 48>}, {pipeline_mode = #tpu.pipeline_mode<synchronous>, transform_indices = @transform_2, window_bounds = array<i64: 32, 1>}, {pipeline_mode = #tpu.pipeline_mode<synchronous>, transform_indices = @transform_3, window_bounds = array<i64: 16, 32>}, {pipeline_mode = #tpu.pipeline_mode<synchronous>, transform_indices = @transform_4, window_bounds = array<i64: 16, 1>}, {transform_indices = @transform_5, window_bounds = array<i64: 32, 128>}, {transform_indices = @transform_6, window_bounds = array<i64: 16, 128>}]} {
    %c0 = arith.constant 0 : index
    %c0_0 = arith.constant 0 : index
    %0 = vector.load %arg2[%c0, %c0_0] : memref<32x48xbf16, #tpu.memory_space<vmem>>, vector<32x48xbf16>
    %c0_1 = arith.constant 0 : index
    %c0_2 = arith.constant 0 : index
    %1 = vector.load %arg1[%c0_1, %c0_2] : memref<48x128xbf16, #tpu.memory_space<vmem>>, vector<48x128xbf16>
    %cst = arith.constant dense<0.000000e+00> : vector<32x128xf32>
    %2 = tpu.matmul %0, %1, %cst {dimension_numbers = #tpu.dot_dimension_numbers<[1], [0], [0], [1], [0, 0, 1, 1], [], []>} : vector<32x48xbf16>, vector<48x128xbf16>, vector<32x128xf32> -> vector<32x128xf32>
    %c0_3 = arith.constant 0 : index
    %c0_4 = arith.constant 0 : index
    %3 = vector.load %arg3[%c0_3, %c0_4] : memref<32x1xf32, #tpu.memory_space<vmem>>, vector<32x1xf32>
    %4 = vector.broadcast %3 : vector<32x1xf32> to vector<32x128xf32>
    %5 = arith.addf %2, %4 : vector<32x128xf32>
    %cst_5 = arith.constant 0.000000e+00 : f32
    %6 = vector.broadcast %cst_5 : f32 to vector<32x128xf32>
    %7 = arith.maximumf %5, %6 : vector<32x128xf32>
    %8 = arith.truncf %7 : vector<32x128xf32> to vector<32x128xbf16>
    %c0_6 = arith.constant 0 : index
    %c0_7 = arith.constant 0 : index
    %9 = vector.load %arg6[%c0_6, %c0_7] : memref<32x128xbf16, #tpu.memory_space<vmem>>, vector<32x128xbf16>
    tpu.vector_store %arg6[%c0_6, %c0_7], %8 {strides = array<i32>} : memref<32x128xbf16, #tpu.memory_space<vmem>>, vector<32x128xbf16>,
    %c0_8 = arith.constant 0 : index
    %c0_9 = arith.constant 0 : index
    %10 = vector.load %arg4[%c0_8, %c0_9] : memref<16x32xbf16, #tpu.memory_space<vmem>>, vector<16x32xbf16>
    %cst_10 = arith.constant dense<0.000000e+00> : vector<16x128xf32>
    %11 = tpu.matmul %10, %8, %cst_10 {dimension_numbers = #tpu.dot_dimension_numbers<[1], [0], [0], [1], [0, 0, 1, 1], [], []>} : vector<16x32xbf16>, vector<32x128xbf16>, vector<16x128xf32> -> vector<16x128xf32>
    %c0_11 = arith.constant 0 : index
    %c0_12 = arith.constant 0 : index
    %12 = vector.load %arg5[%c0_11, %c0_12] : memref<16x1xf32, #tpu.memory_space<vmem>>, vector<16x1xf32>
    %13 = vector.broadcast %12 : vector<16x1xf32> to vector<16x128xf32>
    %14 = arith.addf %11, %13 : vector<16x128xf32>
    %cst_13 = arith.constant 0.000000e+00 : f32
    %15 = vector.broadcast %cst_13 : f32 to vector<16x128xf32>
    %16 = arith.maximumf %14, %15 : vector<16x128xf32>
    %17 = arith.truncf %16 : vector<16x128xf32> to vector<16x128xbf16>
    %c0_14 = arith.constant 0 : index
    %c0_15 = arith.constant 0 : index
    %18 = vector.load %arg7[%c0_14, %c0_15] : memref<16x128xbf16, #tpu.memory_space<vmem>>, vector<16x128xbf16>
    tpu.vector_store %arg7[%c0_14, %c0_15], %17 {strides = array<i32>} : memref<16x128xbf16, #tpu.memory_space<vmem>>, vector<16x128xbf16>,
    return
  }
  func.func @transform_0(%arg0: i32) -> (i32, i32) {
    %c0_i32 = arith.constant 0 : i32
    %c0_i32_0 = arith.constant 0 : i32
    return %c0_i32, %arg0 : i32, i32
  }
  func.func @transform_1(%arg0: i32) -> (i32, i32) {
    %c0_i32 = arith.constant 0 : i32
    %c0_i32_0 = arith.constant 0 : i32
    %c0_i32_1 = arith.constant 0 : i32
    return %c0_i32, %c0_i32_0 : i32, i32
  }
  func.func @transform_2(%arg0: i32) -> (i32, i32) {
    %c0_i32 = arith.constant 0 : i32
    %c0_i32_0 = arith.constant 0 : i32
    %c0_i32_1 = arith.constant 0 : i32
    return %c0_i32, %c0_i32_0 : i32, i32
  }
  func.func @transform_3(%arg0: i32) -> (i32, i32) {
    %c0_i32 = arith.constant 0 : i32
    %c0_i32_0 = arith.constant 0 : i32
    %c0_i32_1 = arith.constant 0 : i32
    return %c0_i32, %c0_i32_0 : i32, i32
  }
  func.func @transform_4(%arg0: i32) -> (i32, i32) {
    %c0_i32 = arith.constant 0 : i32
    %c0_i32_0 = arith.constant 0 : i32
    %c0_i32_1 = arith.constant 0 : i32
    return %c0_i32, %c0_i32_0 : i32, i32
  }
  func.func @transform_5(%arg0: i32) -> (i32, i32) {
    %c0_i32 = arith.constant 0 : i32
    %c0_i32_0 = arith.constant 0 : i32
    return %c0_i32, %arg0 : i32, i32
  }
  func.func @transform_6(%arg0: i32) -> (i32, i32) {
    %c0_i32 = arith.constant 0 : i32
    %c0_i32_0 = arith.constant 0 : i32
    return %c0_i32, %arg0 : i32, i32
  }
}

module attributes {stable_mosaic.version = 11 : i64} {
  func.func @_stem2b_stem3_kernel(%arg0: i32, %arg1: memref<144x128xbf16, #tpu.memory_space<vmem>>, %arg2: memref<32x128xbf16, #tpu.memory_space<vmem>>, %arg3: memref<32x144xbf16, #tpu.memory_space<vmem>>, %arg4: memref<32x1xf32, #tpu.memory_space<vmem>>, %arg5: memref<32x32xbf16, #tpu.memory_space<vmem>>, %arg6: memref<32x32xbf16, #tpu.memory_space<vmem>>, %arg7: memref<32x1xf32, #tpu.memory_space<vmem>>, %arg8: memref<32x128xf32, #tpu.memory_space<vmem>>) attributes {dimension_semantics = [#tpu.dimension_semantics<parallel>], iteration_bounds = array<i64: 1>, scalar_prefetch = 0 : i64, scratch_operands = 0 : i64, tpu.core_type = #tpu.core_type<tc>, window_params = [{transform_indices = @transform_0, window_bounds = array<i64: 144, 128>}, {transform_indices = @transform_1, window_bounds = array<i64: 32, 128>}, {pipeline_mode = #tpu.pipeline_mode<synchronous>, transform_indices = @transform_2, window_bounds = array<i64: 32, 144>}, {pipeline_mode = #tpu.pipeline_mode<synchronous>, transform_indices = @transform_3, window_bounds = array<i64: 32, 1>}, {pipeline_mode = #tpu.pipeline_mode<synchronous>, transform_indices = @transform_4, window_bounds = array<i64: 32, 32>}, {pipeline_mode = #tpu.pipeline_mode<synchronous>, transform_indices = @transform_5, window_bounds = array<i64: 32, 32>}, {pipeline_mode = #tpu.pipeline_mode<synchronous>, transform_indices = @transform_6, window_bounds = array<i64: 32, 1>}, {transform_indices = @transform_7, window_bounds = array<i64: 32, 128>}]} {
    %c0 = arith.constant 0 : index
    %c0_0 = arith.constant 0 : index
    %0 = vector.load %arg3[%c0, %c0_0] : memref<32x144xbf16, #tpu.memory_space<vmem>>, vector<32x144xbf16>
    %c0_1 = arith.constant 0 : index
    %c0_2 = arith.constant 0 : index
    %1 = vector.load %arg1[%c0_1, %c0_2] : memref<144x128xbf16, #tpu.memory_space<vmem>>, vector<144x128xbf16>
    %cst = arith.constant dense<0.000000e+00> : vector<32x128xf32>
    %2 = tpu.matmul %0, %1, %cst {dimension_numbers = #tpu.dot_dimension_numbers<[1], [0], [0], [1], [0, 0, 1, 1], [], []>} : vector<32x144xbf16>, vector<144x128xbf16>, vector<32x128xf32> -> vector<32x128xf32>
    %c0_3 = arith.constant 0 : index
    %c0_4 = arith.constant 0 : index
    %3 = vector.load %arg4[%c0_3, %c0_4] : memref<32x1xf32, #tpu.memory_space<vmem>>, vector<32x1xf32>
    %4 = vector.broadcast %3 : vector<32x1xf32> to vector<32x128xf32>
    %5 = arith.addf %2, %4 : vector<32x128xf32>
    %cst_5 = arith.constant 0.000000e+00 : f32
    %6 = vector.broadcast %cst_5 : f32 to vector<32x128xf32>
    %7 = arith.maximumf %5, %6 : vector<32x128xf32>
    %8 = arith.truncf %7 : vector<32x128xf32> to vector<32x128xbf16>
    %c0_6 = arith.constant 0 : index
    %c0_7 = arith.constant 0 : index
    %9 = vector.load %arg5[%c0_6, %c0_7] : memref<32x32xbf16, #tpu.memory_space<vmem>>, vector<32x32xbf16>
    %c0_8 = arith.constant 0 : index
    %c0_9 = arith.constant 0 : index
    %10 = vector.load %arg2[%c0_8, %c0_9] : memref<32x128xbf16, #tpu.memory_space<vmem>>, vector<32x128xbf16>
    %cst_10 = arith.constant dense<0.000000e+00> : vector<32x128xf32>
    %11 = tpu.matmul %9, %10, %cst_10 {dimension_numbers = #tpu.dot_dimension_numbers<[1], [0], [0], [1], [0, 0, 1, 1], [], []>} : vector<32x32xbf16>, vector<32x128xbf16>, vector<32x128xf32> -> vector<32x128xf32>
    %c0_11 = arith.constant 0 : index
    %c0_12 = arith.constant 0 : index
    %12 = vector.load %arg6[%c0_11, %c0_12] : memref<32x32xbf16, #tpu.memory_space<vmem>>, vector<32x32xbf16>
    %cst_13 = arith.constant dense<0.000000e+00> : vector<32x128xf32>
    %13 = tpu.matmul %12, %8, %cst_13 {dimension_numbers = #tpu.dot_dimension_numbers<[1], [0], [0], [1], [0, 0, 1, 1], [], []>} : vector<32x32xbf16>, vector<32x128xbf16>, vector<32x128xf32> -> vector<32x128xf32>
    %14 = arith.addf %11, %13 : vector<32x128xf32>
    %c0_14 = arith.constant 0 : index
    %c0_15 = arith.constant 0 : index
    %15 = vector.load %arg7[%c0_14, %c0_15] : memref<32x1xf32, #tpu.memory_space<vmem>>, vector<32x1xf32>
    %16 = vector.broadcast %15 : vector<32x1xf32> to vector<32x128xf32>
    %17 = arith.addf %14, %16 : vector<32x128xf32>
    %cst_16 = arith.constant 0.000000e+00 : f32
    %18 = vector.broadcast %cst_16 : f32 to vector<32x128xf32>
    %19 = arith.maximumf %17, %18 : vector<32x128xf32>
    %c0_17 = arith.constant 0 : index
    %c0_18 = arith.constant 0 : index
    %20 = vector.load %arg8[%c0_17, %c0_18] : memref<32x128xf32, #tpu.memory_space<vmem>>, vector<32x128xf32>
    tpu.vector_store %arg8[%c0_17, %c0_18], %19 {strides = array<i32>} : memref<32x128xf32, #tpu.memory_space<vmem>>, vector<32x128xf32>,
    return
  }
  func.func @transform_0(%arg0: i32) -> (i32, i32) {
    %c0_i32 = arith.constant 0 : i32
    %c0_i32_0 = arith.constant 0 : i32
    return %c0_i32, %arg0 : i32, i32
  }
  func.func @transform_1(%arg0: i32) -> (i32, i32) {
    %c0_i32 = arith.constant 0 : i32
    %c0_i32_0 = arith.constant 0 : i32
    return %c0_i32, %arg0 : i32, i32
  }
  func.func @transform_2(%arg0: i32) -> (i32, i32) {
    %c0_i32 = arith.constant 0 : i32
    %c0_i32_0 = arith.constant 0 : i32
    %c0_i32_1 = arith.constant 0 : i32
    return %c0_i32, %c0_i32_0 : i32, i32
  }
  func.func @transform_3(%arg0: i32) -> (i32, i32) {
    %c0_i32 = arith.constant 0 : i32
    %c0_i32_0 = arith.constant 0 : i32
    %c0_i32_1 = arith.constant 0 : i32
    return %c0_i32, %c0_i32_0 : i32, i32
  }
  func.func @transform_4(%arg0: i32) -> (i32, i32) {
    %c0_i32 = arith.constant 0 : i32
    %c0_i32_0 = arith.constant 0 : i32
    %c0_i32_1 = arith.constant 0 : i32
    return %c0_i32, %c0_i32_0 : i32, i32
  }
  func.func @transform_5(%arg0: i32) -> (i32, i32) {
    %c0_i32 = arith.constant 0 : i32
    %c0_i32_0 = arith.constant 0 : i32
    %c0_i32_1 = arith.constant 0 : i32
    return %c0_i32, %c0_i32_0 : i32, i32
  }
  func.func @transform_6(%arg0: i32) -> (i32, i32) {
    %c0_i32 = arith.constant 0 : i32
    %c0_i32_0 = arith.constant 0 : i32
    %c0_i32_1 = arith.constant 0 : i32
    return %c0_i32, %c0_i32_0 : i32, i32
  }
  func.func @transform_7(%arg0: i32) -> (i32, i32) {
    %c0_i32 = arith.constant 0 : i32
    %c0_i32_0 = arith.constant 0 : i32
    return %c0_i32, %arg0 : i32, i32
  }
}

</mosaic_0001>

<bundles_post_ra>
// kernel: stem_block_forward.2
= control target key start
LH: loop header
LB: loop body
LE: loop exit
PB: predicated region body
PF: predicated region fallthrough
CT: control target
= control target key end

     0   :  { %v323_v1 = vmov 0   ;;  %vm85_vm0 = vcmask 392192   ;;  %v324_v12 = vmov 0.0   ;;  %vm325_vm1 = vmmov 0   ;;  %s408_s0 = inlined_call_operand.vmem [shape: bf16[48,128], index: 0, kind: input, shape index: {}]   ;;  %s409_s1 = inlined_call_operand.vmem [shape: bf16[32,48], index: 1, kind: input, shape index: {}]   ;;  %s410_s2 = inlined_call_operand.vmem [shape: f32[32,1], index: 2, kind: input, shape index: {}]   ;;  %s411_s4 = inlined_call_operand.vmem [shape: f32[16,1], index: 4, kind: input, shape index: {}]   ;;  %s412_s3 = inlined_call_operand.vmem [shape: bf16[16,32], index: 3, kind: input, shape index: {}]   ;;  %s413_s5 = inlined_call_operand.vmem [shape: bf16[32,128], index: 5, kind: output, shape index: {0}]   ;;  %s414_s6 = inlined_call_operand.vmem [shape: bf16[16,128], index: 6, kind: output, shape index: {1}]  }
   0x1   :  { %v317_v0 = vld [vmem:[%s408_s0 + $0x10] sm:$0xff]   ;;  %315 = vset.pattern.permute.xlu0 %v323_v1  ;;  %316 = vset.pattern.permute.xlu1 %v323_v1  ;;  %v318_v2 = vld [vmem:[%s408_s0 + $0x8] sm:$0xff]   ;;  %v320_v3 = vld [vmem:[%s409_s1] sm:$0xff]   ;;  %vm184_vm2 = vcmask 261120  }
   0x2   :  { %294 = vmatprep.subr.bf16.mxu0 %v317_v0  ;;  %v319_v4 = vld [vmem:[%s408_s0] sm:$0xff]   ;;  %300 = vmatprep.mubr.msk.bf16.mxu0 %vm85_vm0, %v320_v3  ;;  %v35_v5 = vld [vmem:[%s410_s2 + $0x10] sm:$0xff]  ;;  %v36_v7 = vld [vmem:[%s410_s2 + $0x18] sm:$0xff] }
   0x3   :  { %295 = vmatpush3.bf16.msra.mxu0 %v317_v0  ;;  %v33_v6 = vld [vmem:[%s410_s2] sm:$0xff]  ;;  %49 = vperm.xlu0 %315, %v35_v5   ;;  %v34_v8 = vld [vmem:[%s410_s2 + $0x8] sm:$0xff] }
   0x4   :  { %296 = vmatprep.subr.bf16.mxu0 %v318_v2  ;;  %39 = vperm.xlu1 %316, %v33_v6   ;;  %v321_v9 = vld [vmem:[%s409_s1 + $0x8] sm:$0xff]   ;;  %v167_v10 = vld [vmem:[%s411_s4] sm:$0xff] }
   0x5   :  { %v168_v11 = vld [vmem:[%s411_s4 + $0x8] sm:$0xff]  ;;  %304 = vmatprep.subr.bf16.mxu1 %v324_v12  ;;  %308 = vmatprep.mubr.msk.bf16.mxu1 %vm325_vm1, %v324_v12  ;;  %v322_v31 = vld [vmem:[%s412_s3] sm:$0xff]  }
   0x7   :  { %297 = vmatpush3.bf16.msra.mxu0 %v318_v2  ;;  %54 = vperm.xlu0 %315, %v36_v7  }
   0x8   :  { %298 = vmatprep.subr.bf16.mxu0 %v319_v4  ;;  %44 = vperm.xlu1 %316, %v34_v8  }
   0xb   :  { %299 = vmatpush3.bf16.msra.mxu0 %v319_v4  ;;  %171 = vperm.xlu0 %315, %v167_v10  }
   0xc   :  { %176 = vperm.xlu1 %316, %v168_v11  }
   0xe   :  { %301 = vmatmul.mubr.msk.bf16.vlgmr.msra.gmra.mxu0 %vm85_vm0, %v321_v9 }
  0x7e   :  { %v50_v13 = vpop.permute.xlu0 %49 }
  0x7f   :  { %v40_v14 = vpop.permute.xlu1 %39 }
  0x82   :  { %v55_v18 = vpop.permute.xlu0 %54 }
  0x83   :  { %v45_v22 = vpop.permute.xlu1 %44 }
  0x86   :  { %v172_v33 = vpop.permute.xlu0 %171 }
  0x87   :  { %v177_v36 = vpop.permute.xlu1 %176 }
  0xce   :  { %v302_v15 = vpop.f32.mrf.mxu0 }
  0xcf   :  { %v135_v17 = vadd.f32 %v302_v15, %v50_v13 }
  0xd0   :  { %v126_v16 = vpop.f32.mrf.mxu0 }
  0xd1   :  { %v127_v20 = vadd.f32 %v126_v16, %v40_v14  ;;  %v143_v24 = vmax.f32 %v135_v17, 0.0 }
  0xd2   :  { %v303_v19 = vpop.f32.mrf.mxu0 }
  0xd3   :  { %v138_v21 = vadd.f32 %v303_v19, %v55_v18  ;;  %v141_v27 = vmax.f32 %v127_v20, 0.0 }
  0xd4   :  { %v129_v23 = vpop.f32.mrf.mxu0 }
  0xd5   :  { %v144_v25 = vmax.f32 %v138_v21, 0.0  ;;  %v130_v26 = vadd.f32 %v129_v23, %v45_v22 }
  0xd7   :  { %v142_v28 = vmax.f32 %v130_v26, 0.0  ;;  %v146_v29 = vpack.c.bf16 %v144_v25, %v143_v24 }
  0xd9   :  { %v145_v30 = vpack.c.bf16 %v142_v28, %v141_v27  ;;  %285 = vst [vmem:[%s413_s5 + $0x8] sm:$0xff] %v146_v29   ;;  %305 = vmatpush3.bf16.msra.mxu1 %v146_v29 }
  0xda   :  { %306 = vmatprep.subr.bf16.mxu1 %v324_v12 }
  0xdb   :  { %274 = vst [vmem:[%s413_s5] sm:$0xff] %v145_v30  }
  0xdd   :  { %307 = vmatpush3.bf16.msra.mxu1 %v145_v30 }
  0xe0   :  { %309 = vmatmul.mubr.msk.bf16.vlgmr.msra.gmra.mxu1 %vm184_vm2, %v322_v31 }
 0x1a0   :  { %v222_v32 = vpop.f32.mrf.mxu1 }
 0x1a1   :  { %v223_v35 = vadd.f32 %v222_v32, %v172_v33 }
 0x1a2   :  { %v310_v34 = vpop.f32.mrf.mxu1 }
 0x1a3   :  { %v229_v40 = vmax.f32 %v223_v35, 0.0 }
 0x1a4   :  { %v225_v37 = vpop.f32.mrf.mxu1 }
 0x1a5   :  { %v226_v38 = vadd.f32 %v225_v37, %v177_v36 }
 0x1a6   :  { %v311_v39 = vpop.f32.mrf.mxu1 }
 0x1a7   :  { %v230_v41 = vmax.f32 %v226_v38, 0.0 }
 0x1a9   :  { %v283_v42 = vpack.c.bf16 %v230_v41, %v229_v40 }
 0x1ab   :  { %284 = vst [vmem:[%s414_s6] sm:$0xff] %v283_v42  }

// kernel: stem_block_forward.3
= control target key start
LH: loop header
LB: loop body
LE: loop exit
PB: predicated region body
PF: predicated region fallthrough
CT: control target
= control target key end

     0   :  { %v475_v0 = vmov 0   ;;  %vm145_vm0 = vcmask 130048   ;;  %vm229_vm1 = vcmask 261120   ;;  %s615_s0 = inlined_call_operand.vmem [shape: bf16[144,128], index: 0, kind: input, shape index: {}]   ;;  %s616_s2 = inlined_call_operand.vmem [shape: bf16[32,144], index: 2, kind: input, shape index: {}]   ;;  %s617_s3 = inlined_call_operand.vmem [shape: f32[32,1], index: 3, kind: input, shape index: {}]   ;;  %s618_s6 = inlined_call_operand.vmem [shape: f32[32,1], index: 6, kind: input, shape index: {}]   ;;  %s619_s5 = inlined_call_operand.vmem [shape: bf16[32,32], index: 5, kind: input, shape index: {}]   ;;  %s620_s1 = inlined_call_operand.vmem [shape: bf16[32,128], index: 1, kind: input, shape index: {}]   ;;  %s621_s4 = inlined_call_operand.vmem [shape: bf16[32,32], index: 4, kind: input, shape index: {}]   ;;  %s622_s7 = inlined_call_operand.vmem [shape: f32[32,128], index: 7, kind: output, shape index: {}]  }
   0x1   :  { %152 = vmatprep.subr.bf16.mxu0 %v475_v0  ;;  %v454_v1 = vld [vmem:[%s615_s0 + $0x38] sm:$0xff]   ;;  %452 = vset.pattern.permute.xlu0 %v475_v0  ;;  %v455_v2 = vld [vmem:[%s615_s0 + $0x30] sm:$0xff]   ;;  %v456_v3 = vld [vmem:[%s615_s0 + $0x28] sm:$0xff]  }
   0x2   :  { %453 = vset.pattern.permute.xlu1 %v475_v0  ;;  %153 = vmatpush1.bf16.msra.mxu0 %v454_v1  ;;  %v457_v4 = vld [vmem:[%s615_s0 + $0x20] sm:$0xff]   ;;  %v51_v6 = vld [vmem:[%s617_s3 + $0x10] sm:$0xff]  ;;  %v52_v8 = vld [vmem:[%s617_s3 + $0x18] sm:$0xff] }
   0x3   :  { %154 = vmatprep.subr.bf16.mxu0 %v475_v0  ;;  %v465_v5 = vld [vmem:[%s616_s2 + $0x4] ss:$8 sps:$4 sm:$0xff]   ;;  %65 = vperm.xlu0 %452, %v51_v6   ;;  %v458_v9 = vld [vmem:[%s615_s0 + $0x18] sm:$0xff]   ;;  %v459_v12 = vld [vmem:[%s615_s0 + $0x10] sm:$0xff]  }
   0x4   :  { %415 = vmatprep.mubr.msk.bf16.mxu0 %vm145_vm0, %v465_v5  ;;  %v49_v7 = vld [vmem:[%s617_s3] sm:$0xff]  ;;  %v50_v10 = vld [vmem:[%s617_s3 + $0x8] sm:$0xff]  ;;  %v364_v14 = vld [vmem:[%s618_s6 + $0x10] sm:$0xff] }
   0x5   :  { %55 = vperm.xlu1 %453, %v49_v7   ;;  %v362_v11 = vld [vmem:[%s618_s6] sm:$0xff]  ;;  %v363_v13 = vld [vmem:[%s618_s6 + $0x8] sm:$0xff]  ;;  %v365_v16 = vld [vmem:[%s618_s6 + $0x18] sm:$0xff] }
   0x6   :  { %155 = vmatpush1.bf16.msra.mxu0 %v455_v2  ;;  %v460_v15 = vld [vmem:[%s615_s0 + $0x8] sm:$0xff]   ;;  %v461_v17 = vld [vmem:[%s615_s0] sm:$0xff]   ;;  %v466_v20 = vld [vmem:[%s616_s2 + $0x14] ss:$8 sps:$4 sm:$0xff]  }
   0x7   :  { %156 = vmatprep.subr.bf16.mxu0 %v475_v0  ;;  %70 = vperm.xlu0 %452, %v52_v8   ;;  %v462_v18 = vld [vmem:[%s615_s0 + $0x40] sm:$0xff]   ;;  %v468_v21 = vld [vmem:[%s616_s2 + $0x10] ss:$8 sps:$4 sm:$0xff]   ;;  %v471_v45 = vld [vmem:[%s620_s1 + $0x8] sm:$0xff]  }
   0x8   :  { %v463_v19 = vld [vmem:[%s616_s2] ss:$8 sps:$4 sm:$0xff]  }
   0x9   :  { %60 = vperm.xlu1 %453, %v50_v10   ;;  %v469_v22 = vld [vmem:[%s619_s5] sm:$0xff]   ;;  %v470_v46 = vld [vmem:[%s619_s5 + $0x8] sm:$0xff]  }
   0xa   :  { %157 = vmatpush1.bf16.msra.mxu0 %v456_v3  ;;  %439 = vmatprep.mubr.msk.bf16.mxu1 %vm229_vm1, %v469_v22  ;;  %v473_v47 = vld [vmem:[%s621_s4] sm:$0xff]   ;;  %v474_v49 = vld [vmem:[%s621_s4 + $0x8] sm:$0xff]  }
   0xb   :  { %158 = vmatprep.subr.bf16.mxu0 %v475_v0  ;;  %368 = vperm.xlu0 %452, %v362_v11   ;;  %v472_v48 = vld [vmem:[%s620_s1] sm:$0xff]  }
   0xd   :  { %373 = vperm.xlu1 %453, %v363_v13  }
   0xe   :  { %159 = vmatpush1.bf16.msra.mxu0 %v457_v4 }
   0xf   :  { %160 = vmatprep.subr.bf16.mxu0 %v475_v0  ;;  %378 = vperm.xlu0 %452, %v364_v14  }
  0x11   :  { %383 = vperm.xlu1 %453, %v365_v16  }
  0x12   :  { %161 = vmatpush1.bf16.msra.mxu0 %v458_v9 }
  0x13   :  { %162 = vmatprep.subr.bf16.mxu0 %v475_v0 }
  0x16   :  { %163 = vmatpush1.bf16.msra.mxu0 %v459_v12 }
  0x17   :  { %164 = vmatprep.subr.bf16.mxu0 %v475_v0 }
  0x1a   :  { %165 = vmatpush1.bf16.msra.mxu0 %v460_v15 }
  0x1b   :  { %166 = vmatprep.subr.bf16.mxu0 %v475_v0 }
  0x1e   :  { %167 = vmatpush1.bf16.msra.mxu0 %v461_v17 }
  0x1f   :  { %182 = vmatprep.subr.bf16.mxu0 %v475_v0 }
  0x22   :  { %183 = vmatpush2.bf16.msra.mxu0 %v462_v18 }
  0x25   :  { %185 = vmatmul.mubr.bf16.vlgmr.msra.gmra.mxu0 %v463_v19 }
  0x26   :  { %416 = vmatprep.mubr.msk.bf16.mxu0 %vm145_vm0, %v466_v20 }
  0x2d   :  { %193 = vmatmul.mubr.bf16.gmra.mxu0 %v468_v21 }
  0x7e   :  { %v66_v27 = vpop.permute.xlu0 %65 }
  0x80   :  { %v56_v24 = vpop.permute.xlu1 %55 }
  0x82   :  { %v71_v34 = vpop.permute.xlu0 %70 }
  0x84   :  { %v61_v29 = vpop.permute.xlu1 %60 }
  0x86   :  { %v369_v52 = vpop.permute.xlu0 %368 }
  0x88   :  { %v374_v55 = vpop.permute.xlu1 %373 }
  0x8a   :  { %v379_v58 = vpop.permute.xlu0 %378 }
  0x8c   :  { %v384_v2 = vpop.permute.xlu1 %383 }
  0xe5   :  { %v186_v23 = vpop.f32.mrf.mxu0 }
  0xe6   :  { %v187_v36 = vadd.f32 %v186_v23, %v56_v24 }
  0xe7   :  { %v188_v25 = vpop.f32.mrf.mxu0 }
  0xe8   :  { %v201_v42 = vmax.f32 %v187_v36, 0.0 }
  0xe9   :  { %v189_v26 = vpop.f32.mrf.mxu0 }
  0xea   :  { %v190_v32 = vadd.f32 %v189_v26, %v61_v29 }
  0xeb   :  { %v191_v28 = vpop.f32.mrf.mxu0 }
  0xec   :  { %v202_v39 = vmax.f32 %v190_v32, 0.0 }
  0xed   :  { %v194_v30 = vpop.f32.mrf.mxu0 }
  0xee   :  { %v195_v33 = vadd.f32 %v194_v30, %v66_v27  ;;  %v205_v44 = vpack.c.bf16 %v202_v39, %v201_v42 }
  0xef   :  { %v196_v31 = vpop.f32.mrf.mxu0 }
  0xf0   :  { %v203_v40 = vmax.f32 %v195_v33, 0.0 }
  0xf1   :  { %v197_v35 = vpop.f32.mrf.mxu0 }
  0xf2   :  { %v198_v37 = vadd.f32 %v197_v35, %v71_v34 }
  0xf3   :  { %v199_v38 = vpop.f32.mrf.mxu0 }
  0xf4   :  { %v204_v41 = vmax.f32 %v198_v37, 0.0 }
  0xf6   :  { %v206_v43 = vpack.c.bf16 %v204_v41, %v203_v40 }
  0xf8   :  { %435 = vmatprep.subr.bf16.mxu1 %v206_v43 }
  0xf9   :  { %436 = vmatpush3.bf16.msra.mxu1 %v206_v43 }
  0xfa   :  { %437 = vmatprep.subr.bf16.mxu1 %v205_v44 }
  0xfd   :  { %438 = vmatpush3.bf16.msra.mxu1 %v205_v44 }
  0xfe   :  { %443 = vmatprep.subr.bf16.mxu1 %v471_v45 }
 0x100   :  { %440 = vmatmul.mubr.msk.bf16.vlgmr.msra.gmra.mxu1 %vm229_vm1, %v470_v46 }
 0x101   :  { %444 = vmatpush3.bf16.msra.mxu1 %v471_v45  ;;  %447 = vmatprep.mubr.msk.bf16.mxu1 %vm229_vm1, %v473_v47 }
 0x102   :  { %445 = vmatprep.subr.bf16.mxu1 %v472_v48 }
 0x105   :  { %446 = vmatpush3.bf16.msra.mxu1 %v472_v48 }
 0x108   :  { %448 = vmatmul.mubr.msk.bf16.vlgmr.msra.gmra.mxu1 %vm229_vm1, %v474_v49 }
 0x1c0   :  { %v441_v50 = vpop.f32.mrf.mxu1 }
 0x1c2   :  { %v270_v51 = vpop.f32.mrf.mxu1 }
 0x1c4   :  { %v442_v53 = vpop.f32.mrf.mxu1 }
 0x1c6   :  { %v273_v54 = vpop.f32.mrf.mxu1 }
 0x1c8   :  { %v449_v56 = vpop.f32.mrf.mxu1 }
 0x1c9   :  { %v356_v57 = vadd.f32 %v449_v56, %v441_v50 }
 0x1ca   :  { %v347_v59 = vpop.f32.mrf.mxu1 }
 0x1cb   :  { %v388_v60 = vadd.f32 %v379_v58, %v356_v57  ;;  %v348_v61 = vadd.f32 %v347_v59, %v270_v51 }
 0x1cc   :  { %v450_v62 = vpop.f32.mrf.mxu1 }
 0x1cd   :  { %v392_v63 = vmax.f32 %v388_v60, 0.0  ;;  %v386_v0 = vadd.f32 %v369_v52, %v348_v61  ;;  %v359_v1 = vadd.f32 %v450_v62, %v442_v53 }
 0x1ce   :  { %v350_v3 = vpop.f32.mrf.mxu1 }
 0x1cf   :  { %396 = vst [vmem:[%s622_s7 + $0x10] sm:$0xff] %v392_v63  ;;  %v390_v4 = vmax.f32 %v386_v0, 0.0  ;;  %v389_v5 = vadd.f32 %v384_v2, %v359_v1  ;;  %v351_v6 = vadd.f32 %v350_v3, %v273_v54 }
 0x1d1   :  { %394 = vst [vmem:[%s622_s7] sm:$0xff] %v390_v4  ;;  %v393_v7 = vmax.f32 %v389_v5, 0.0  ;;  %v387_v8 = vadd.f32 %v374_v55, %v351_v6 }
 0x1d3   :  { %397 = vst [vmem:[%s622_s7 + $0x18] sm:$0xff] %v393_v7  ;;  %v391_v9 = vmax.f32 %v387_v8, 0.0 }
 0x1d5   :  { %395 = vst [vmem:[%s622_s7 + $0x8] sm:$0xff] %v391_v9 }

</bundles_post_ra>
